<compile_context>
chip_gen: v6e
topology: v6e:2x2x1
jax: 0.10.0
libtpu: 0.0.40
codegen_flags: <defaults>
</compile_context>

<pallas_src>
import math

import jax
import jax.numpy as jnp
from jax.experimental import pallas as pl
from jax.experimental.pallas import tpu as pltpu


# ----------------------------------------------------------------------------
# VMEM-aware tiling helpers
# ----------------------------------------------------------------------------
_LANE_CANDS = (16384, 8192, 4096, 2048, 1024, 512, 256, 128)
_VMEM_WS_BUDGET = 24 << 20   # target double-buffered working set (fits v5e/v6e/v7x)
_VMEM_LIMIT = 48 << 20       # scoped VMEM limit handed to Mosaic (< 64 MiB v7x phys)
_MIN_PALLAS_LANES = 128      # below this, lane-dense stores are impossible -> XLA


def _pick_lane_tile(L, bytes_per_lane):
    """Largest lane tile (multiple of 128) dividing L whose double-buffered
    working set fits the VMEM budget; full extent for non-128-divisible L."""
    max_tl = _VMEM_WS_BUDGET // max(1, bytes_per_lane)
    for t in _LANE_CANDS:
        if t <= max_tl and L % t == 0:
            return t
    return 128 if L % 128 == 0 else L


def _pick_sublane_tile(N):
    """8-row (full-sublane) blocks when possible -> more parallel grid steps for
    megacore and a small static unroll inside the PE kernel."""
    return 8 if N % 8 == 0 else N


def _mosaic_params(*sem):
    return pltpu.CompilerParams(dimension_semantics=sem,
                                vmem_limit_bytes=_VMEM_LIMIT)


# ----------------------------------------------------------------------------
# Kernel 1: SeqRevFuseMS level  --  LeakyReLU_0.1( Conv1x1( cat([x_seq, x_rev]) ) )
# Native-NCHW layout: out(Cout, TL) = Ws(Cout,C)@xs(C,TL) + Wr(Cout,C)@xr(C,TL) + b
# Spatial axis on lanes -> lane-dense loads/stores, no wrapper transposes.
# ----------------------------------------------------------------------------
def _fuse_kernel(ws_ref, wr_ref, b_ref, xs_ref, xr_ref, o_ref):
    xs = xs_ref[0]                                    # (C, TL)
    xr = xr_ref[0]                                    # (C, TL)
    # Two K=C dots with resident weights; merging into one K=2C dot only pays off
    # when C reaches the MXU contraction tile (wide pyramid levels).
    acc = jnp.dot(ws_ref[...], xs, preferred_element_type=jnp.float32)
    acc = acc + jnp.dot(wr_ref[...], xr, preferred_element_type=jnp.float32)
    acc = acc + b_ref[...]                            # (Cout, 1) lane broadcast
    o_ref[0] = jnp.where(acc >= 0, acc, 0.1 * acc).astype(o_ref.dtype)


def fuse_1x1_leakyrelu(xs_nchw, xr_nchw, w, b):
    """xs/xr: (N, C, H, W) NCHW.  w: (Cout, 2*Cin) conv-1x1 weight, b: (Cout,)."""
    N, C, H, W = xs_nchw.shape
    Cout = w.shape[0]
    L = H * W
    if L < _MIN_PALLAS_LANES:
        # Tiny pyramid level: masked partial stores + grid overhead dominate; XLA.
        cat = jnp.concatenate([xs_nchw, xr_nchw], axis=1)
        y = jnp.einsum('oc,bchw->bohw', w, cat) + b[None, :, None, None]
        return jnp.where(y >= 0, y, 0.1 * y)

    xs = xs_nchw.reshape(N, C, L)                     # free reshape, stays NCHW
    xr = xr_nchw.reshape(N, C, L)
    ws, wr = w[:, :C], w[:, C:]
    bias = b.reshape(Cout, 1)
    itemsize = jnp.dtype(xs_nchw.dtype).itemsize
    TL = _pick_lane_tile(L, (2 * C + Cout) * itemsize * 2)
    out = pl.pallas_call(
        _fuse_kernel,
        out_shape=jax.ShapeDtypeStruct((N, Cout, L), xs_nchw.dtype),
        grid_spec=pltpu.PrefetchScalarGridSpec(
            num_scalar_prefetch=0,
            grid=(N, L // TL),
            in_specs=[
                pl.BlockSpec((Cout, C), lambda n, l: (0, 0)),
                pl.BlockSpec((Cout, C), lambda n, l: (0, 0)),
                pl.BlockSpec((Cout, 1), lambda n, l: (0, 0)),
                pl.BlockSpec((1, C, TL), lambda n, l: (n, 0, l)),
                pl.BlockSpec((1, C, TL), lambda n, l: (n, 0, l)),
            ],
            out_specs=pl.BlockSpec((1, Cout, TL), lambda n, l: (n, 0, l)),
        ),
        compiler_params=_mosaic_params("parallel", "parallel"),
    )(ws, wr, bias, xs, xr)
    return out.reshape(N, Cout, H, W)


# ----------------------------------------------------------------------------
# Kernel 2: NeuralFilmPyramid level -- broadcast a (1, C) embedding to (B, C, H, W)
# Output emitted directly in NCHW with spatial on lanes (lane-dense stores).
# ----------------------------------------------------------------------------
def _film_kernel(emb_ref, o_ref):
    o_ref[0] = jnp.broadcast_to(emb_ref[...], o_ref.shape[1:])


def film_broadcast(emb, B, H, W):
    C = emb.shape[1]
    L = H * W
    if L < _MIN_PALLAS_LANES:
        return jnp.broadcast_to(emb[0][None, :, None, None], (B, C, H, W))
    emb_col = emb.reshape(C, 1)
    itemsize = jnp.dtype(emb.dtype).itemsize
    TL = _pick_lane_tile(L, C * itemsize * 2)
    out = pl.pallas_call(
        _film_kernel,
        out_shape=jax.ShapeDtypeStruct((B, C, L), emb.dtype),
        grid_spec=pltpu.PrefetchScalarGridSpec(
            num_scalar_prefetch=0,
            grid=(B, L // TL),
            in_specs=[pl.BlockSpec((C, 1), lambda b, l: (0, 0))],
            out_specs=pl.BlockSpec((1, C, TL), lambda b, l: (b, 0, l)),
        ),
        compiler_params=_mosaic_params("parallel", "parallel"),
    )(emb_col)
    return out.reshape(B, C, H, W)


# ----------------------------------------------------------------------------
# Kernel 3: relative time spectrum -> NeRF positional encoding ('lin_sine')
# pe(x) = [sin(k*pi*x), cos(k*pi*x)]_{k=1..depth}, x = tspec - mean_{H,W}(ref_tspec)
# Mean-centering is fused into the kernel; cos is a pi/2-shifted sin so a single
# broadcasted sin over the (2*depth, TL) harmonic tile produces full-sublane,
# lane-dense stores (no per-harmonic masked vst, no recurrence drift).
# TODO(synk): NerfPositionalEncoding source is not provided; the standard
#             lin_sine definition above is assumed.
# ----------------------------------------------------------------------------
def _pe_kernel(mean_ref, fp_ref, ph_ref, x_ref, o_ref):
    tn, tl = x_ref.shape
    two_depth = o_ref.shape[1]
    rel = x_ref[...] - mean_ref[...]          # (TN, TL): centering fused in-kernel
    fp = fp_ref[...]                          # (2*depth, 1): (k//2 + 1) * pi
    ph = ph_ref[...]                          # (2*depth, 1): 0 or pi/2 (cos = shifted sin)
    for n in range(tn):                       # static unroll, TN <= 8
        rel_n = jnp.broadcast_to(rel[n:n + 1, :], (two_depth, tl))
        o_ref[n] = jnp.sin(rel_n * fp + ph).astype(o_ref.dtype)


def nerf_pe_rel_tspec(tspec, ref_tspec, depth):
    """tspec: (B, T, H, W), ref_tspec: (B, 1, H, W) -> (B, T, 2*depth, H, W)."""
    B, T, H, W = tspec.shape
    N, L = B * T, H * W
    two_depth = 2 * depth
    dt = tspec.dtype
    ref_mean = jnp.mean(ref_tspec, axis=(-1, -2))                  # (B, 1) massive center

    if L < _MIN_PALLAS_LANES:                                      # tiny spatial: plain XLA
        rel = tspec - ref_mean[:, :, None, None]
        ks = jnp.arange(1, depth + 1, dtype=dt)[None, None, :, None, None]
        ang = ks * math.pi * rel[:, :, None]
        pe = jnp.stack([jnp.sin(ang), jnp.cos(ang)], axis=3)       # (B,T,depth,2,H,W)
        return pe.reshape(B, T, two_depth, H, W)

    x = tspec.reshape(N, L)
    mean_col = jnp.broadcast_to(ref_mean, (B, T)).reshape(N, 1).astype(dt)
    k = jnp.arange(two_depth)
    freq_pi = ((k // 2 + 1).astype(dt) * math.pi).reshape(two_depth, 1)
    phase = ((k % 2).astype(dt) * (math.pi / 2)).reshape(two_depth, 1)

    TN = _pick_sublane_tile(N)
    itemsize = jnp.dtype(dt).itemsize
    TL = _pick_lane_tile(L, TN * (1 + two_depth) * itemsize * 2)
    out = pl.pallas_call(
        _pe_kernel,
        out_shape=jax.ShapeDtypeStruct((N, two_depth, L), dt),
        grid_spec=pltpu.PrefetchScalarGridSpec(
            num_scalar_prefetch=0,
            grid=(N // TN, L // TL),
            in_specs=[
                pl.BlockSpec((TN, 1), lambda n, l: (n, 0)),
                pl.BlockSpec((two_depth, 1), lambda n, l: (0, 0)),
                pl.BlockSpec((two_depth, 1), lambda n, l: (0, 0)),
                pl.BlockSpec((TN, TL), lambda n, l: (n, l)),
            ],
            out_specs=pl.BlockSpec((TN, two_depth, TL), lambda n, l: (n, 0, l)),
        ),
        compiler_params=_mosaic_params("parallel", "parallel"),
    )(mean_col, freq_pi, phase, x)
    return out.reshape(B, T, two_depth, H, W)


# ----------------------------------------------------------------------------
# NIRE wrapper (implemented sub-modules only)
# ----------------------------------------------------------------------------
class NIREPallas:
    def __init__(self, dims, pe_dim, key):
        self.dims = list(dims)
        self.pe_dim = pe_dim
        self.film_emb, self.fuse_w, self.fuse_b = [], [], []
        for i, c in enumerate(self.dims):
            k_e = jax.random.fold_in(key, 3 * i)
            k_w = jax.random.fold_in(key, 3 * i + 1)
            k_b = jax.random.fold_in(key, 3 * i + 2)
            self.film_emb.append(jax.random.normal(k_e, (1, c), jnp.float32))
            bound = 1.0 / math.sqrt(2 * c)       # PyTorch Conv2d default init range
            self.fuse_w.append(jax.random.uniform(k_w, (c, 2 * c), jnp.float32, -bound, bound))
            self.fuse_b.append(jax.random.uniform(k_b, (c,), jnp.float32, -bound, bound))

    # NeuralFilmPyramid.forward
    # TODO(synk): the consumer (TemporalizeModuleMS attention) is undefined in the
    # source; once available, fold this pure-broadcast into that kernel instead of
    # materializing the pyramid in HBM.
    def vir_feat_base(self, seq_shape_list, seq_len=1):
        assert len(self.film_emb) == len(seq_shape_list)
        pyr = []
        for emb, shp in zip(self.film_emb, seq_shape_list):
            B, _, C, H, W = shp
            assert C == emb.shape[1]
            pyr.append(film_broadcast(emb, B, H, W))
        return [pyr] * seq_len

    # SeqRevFuseMS.forward: per-timestep / per-level calls on the original tensors
    # (no jnp.stack re-materialization of the inputs in HBM).
    def seqrev_fuse(self, x_ms_seq, x_ms_rev):
        out = []
        for t in range(len(x_ms_seq)):
            node = []
            for l in range(len(self.fuse_w)):
                node.append(fuse_1x1_leakyrelu(x_ms_seq[t][l], x_ms_rev[t][l],
                                               self.fuse_w[l], self.fuse_b[l]))
            out.append(node)
        return out

    # NIRE.get_rel_tspec
    def get_rel_tspec(self, tspec, ref_tspec):
        return nerf_pe_rel_tspec(tspec, ref_tspec, self.pe_dim)


if __name__ == "__main__":
    B, T, H, W = 2, 2, 32, 32
    base = 8
    dims = [base, 2 * base, 4 * base]   # encoder pyramid widths (3 levels)
    pe_dim = 4

    model = NIREPallas(dims, pe_dim, key=jax.random.PRNGKey(42))

    key = jax.random.PRNGKey(0)
    im_tspec = jax.random.uniform(jax.random.fold_in(key, 1), (B, T, H, W), jnp.float32)
    tgt_tspec = jax.random.uniform(jax.random.fold_in(key, 2), (B, 1, H, W), jnp.float32)

    # TODO(synk): ev_encoder (recurrent e2vid encoder) is undefined; feed stand-in
    # forward/reverse multi-scale feature pyramids with the correct shapes.
    n_seq = 2
    ev_seq, ev_rev = [], []
    for t in range(n_seq):
        lvl_s, lvl_r = [], []
        for l, c in enumerate(dims):
            h, w = H // (2 ** l), W // (2 ** l)
            lvl_s.append(jax.random.normal(jax.random.fold_in(key, 100 + 10 * t + 2 * l),
                                           (B, c, h, w), jnp.float32))
            lvl_r.append(jax.random.normal(jax.random.fold_in(key, 100 + 10 * t + 2 * l + 1),
                                           (B, c, h, w), jnp.float32))
        ev_seq.append(lvl_s)
        ev_rev.append(lvl_r)

    # 1) virtual "neural film" feature pyramid
    seq_shapes = [(B, T, c, H // (2 ** l), W // (2 ** l)) for l, c in enumerate(dims)]
    vir_feat = model.vir_feat_base(seq_shapes, seq_len=1)

    # 2) bidirectional event-feature fusion (SeqRevFuseMS)
    ev_feat = model.seqrev_fuse(ev_seq, ev_rev)

    # 3) relative time encoding for the first target time step
    rel_te = model.get_rel_tspec(im_tspec, tgt_tspec[:, 0:1])

    jax.block_until_ready((vir_feat, ev_feat, rel_te))

    # --- correctness spot-checks against plain-JAX references ---------------
    for l, c in enumerate(dims):
        h, w = H // (2 ** l), W // (2 ** l)
        ref = jnp.broadcast_to(model.film_emb[l][0][None, :, None, None], (B, c, h, w))
        assert jnp.allclose(vir_feat[0][l], ref, atol=1e-6), "NeuralFilmPyramid kernel mismatch"

    for t in range(n_seq):
        for l in range(len(dims)):
            cat = jnp.concatenate([ev_seq[t][l], ev_rev[t][l]], axis=1)
            ref = jnp.einsum('oc,bchw->bohw', model.fuse_w[l], cat) \
                + model.fuse_b[l][None, :, None, None]
            ref = jnp.where(ref >= 0, ref, 0.1 * ref)
            assert jnp.allclose(ev_feat[t][l], ref, atol=1e-4), "SeqRevFuseMS kernel mismatch"

    rel = im_tspec - jnp.mean(tgt_tspec[:, 0:1], axis=(-1, -2), keepdims=True)
    pe_ref = []
    for k in range(pe_dim):
        pe_ref.append(jnp.sin((k + 1) * math.pi * rel))
        pe_ref.append(jnp.cos((k + 1) * math.pi * rel))
    pe_ref = jnp.stack(pe_ref, axis=2)
    assert rel_te.shape == (B, T, 2 * pe_dim, H, W)
    assert jnp.allclose(rel_te, pe_ref, atol=1e-4), "time-encoding kernel mismatch"

    print("KERNEL_OK")
</pallas_src>

<mosaic_0001>
module attributes {stable_mosaic.version = 11 : i64} {
  func.func @_film_kernel(%arg0: i32, %arg1: i32, %arg2: memref<8x1xf32, #tpu.memory_space<vmem>>, %arg3: memref<1x8x1024xf32, #tpu.memory_space<vmem>>) attributes {dimension_semantics = [#tpu.dimension_semantics<parallel>, #tpu.dimension_semantics<parallel>], iteration_bounds = array<i64: 2, 1>, scalar_prefetch = 0 : i64, scratch_operands = 0 : i64, tpu.core_type = #tpu.core_type<tc>, window_params = [{pipeline_mode = #tpu.pipeline_mode<synchronous>, transform_indices = @transform_0, window_bounds = array<i64: 8, 1>}, {transform_indices = @transform_1, window_bounds = array<i64: 1, 8, 1024>}]} {
    %c0 = arith.constant 0 : index
    %c0_0 = arith.constant 0 : index
    %0 = vector.load %arg2[%c0, %c0_0] : memref<8x1xf32, #tpu.memory_space<vmem>>, vector<8x1xf32>
    %1 = vector.shape_cast %0 : vector<8x1xf32> to vector<8x1xf32>
    %2 = vector.broadcast %1 : vector<8x1xf32> to vector<8x1024xf32>
    %c0_1 = arith.constant 0 : index
    %c0_2 = arith.constant 0 : index
    %c0_3 = arith.constant 0 : index
    %3 = vector.load %arg3[%c0_1, %c0_2, %c0_3] : memref<1x8x1024xf32, #tpu.memory_space<vmem>>, vector<1x8x1024xf32>
    %4 = vector.shape_cast %3 : vector<1x8x1024xf32> to vector<8x1024xf32>
    %5 = vector.shape_cast %2 : vector<8x1024xf32> to vector<1x8x1024xf32>
    tpu.vector_store %arg3[%c0_1, %c0_2, %c0_3], %5 {strides = array<i32>} : memref<1x8x1024xf32, #tpu.memory_space<vmem>>, vector<1x8x1024xf32>,
    return
  }
  func.func @transform_0(%arg0: i32, %arg1: i32) -> (i32, i32) {
    %c0_i32 = arith.constant 0 : i32
    %c0_i32_0 = arith.constant 0 : i32
    %c0_i32_1 = arith.constant 0 : i32
    return %c0_i32, %c0_i32_0 : i32, i32
  }
  func.func @transform_1(%arg0: i32, %arg1: i32) -> (i32, i32, i32) {
    %c0_i32 = arith.constant 0 : i32
    %c0_i32_0 = arith.constant 0 : i32
    return %arg0, %c0_i32, %arg1 : i32, i32, i32
  }
}

</mosaic_0001>

<bundles_post_ra>
// kernel: tpu_custom_call.1
= control target key start
LH: loop header
LB: loop body
LE: loop exit
PB: predicated region body
PF: predicated region fallthrough
CT: control target
= control target key end

     0   :  { %6 = vsyncpa [#allocation3], 0  ;;  %s466_s0 = inlined_call_operand.vmem [shape: f32[8,1], index: 0, kind: input, shape index: {}]   ;;  %s467_s1 = inlined_call_operand.hbm [shape: f32[2,8,1024], index: 1, kind: output, shape index: {}]  }
   0x1   :  { %8 = vsyncpa [#allocation3 + $0x1], 0  ;;  %s357_s6 = smov 0   ;;  %s359_s7 = smov 0  }
   0x2   :  { %s361_s8 = smov 0   ;;  %s363_s9 = smov 0  }
   0x3   :  { %s365_s10 = smov 0   ;;  %s367_s11 = smov 0  }
   0x4 LB: > { %s199_s12 = sadd.s32 4294967295, %s343_s11   ;;  %s200_s13 = sadd.s32 4294967294, %s343_s11   ;;  %s343_s11 = sphi %s367_s11, %s14_s11   ;;  %s339_s10 = sphi %s365_s10, %s474_s10   ;;  %s335_s9 = sphi %s363_s9, %s473_s9   ;;  %s331_s8 = sphi %s361_s8, %s472_s8   ;;  %s327_s7 = sphi %s359_s7, %s471_s7   ;;  %s323_s6 = sphi %s357_s6, %s470_s6  }
   0x5   : > { %s26_s14 = sadd.s32 1, %s339_s10  ;;  %s56_s15 = sadd.s32 1, %s331_s8 }
   0x6   : > { %p28_p0 = scmp.ge.s32.totalorder %s26_s14, 2  ;;  %p66_p1 = scmp.ne.s32.totalorder %s331_s8, %s327_s7 }
   0x7   : > { %p67_p2 = scmp.eq.s32.totalorder %s199_s12, 1  ;;  %p72_p3 = scmp.ne.s32.totalorder %s327_s7, %s323_s6 }
   0x8   : > { %s476_s14 = smov (%p28_p0, %s26_s14), 0  ;;  %p73_p5 = scmp.eq.s32.totalorder %s200_s13, 1 }
   0x9   : > { %p397_p4 = por %p67_p2, %p66_p1  ;;  %s51_s17 = ssub.s32 %s339_s10, %s476_s14 }
   0xa   : > { %p202_p6 = scmp.ge.s32.totalorder %s343_s11, 1  ;;  %p54_p7 = scmp.eq.s32.totalorder %s51_s17, 0 }
   0xb   : > { %p404_p8 = por %p73_p5, %p72_p3  ;;  %p94_p9 = scmp.lt.s32.totalorder %s343_s11, 3 }
   0xc   : > { %s410_s19 = scalar_select %p54_p7, %s331_s8, %s56_s15  }
   0xd   : > { %p95_p10 = pnand %p202_p6, %p94_p9 }
   0xe   : > { %s106_s22 = sand.u32 (!%p95_p10), 1, %s327_s7   ;;  %s209_s24 = sshll.u32 (!%p95_p10), %s335_s9, 10 }
   0xf   : > { %98 = sbr.rel (%p95_p10) target bundleno = 162 (0xa2), region = 24  ;;  %s203_s23 = sshll.u32 (!%p95_p10), %s106_s22, 6 }
  0x10   : > { %s108_s25 = scalar_lea.vmem (!%p95_p10), [#allocation2], %s203_s23  ;;  %s420_s29 = scalar_lea.hbm (!%p95_p10), %s467_s1, %s209_s24 }
  0x11   : > { %s141_s26 = sshll.u32 (!%p95_p10), %s108_s25, 4  ;;  %s125_s30 = scalar_lea.sflag (!%p95_p10), [#allocation3], %s106_s22  ;;  %s422_s26 = int_to_ptr.vmem [resolvable:$true] %s141_s26 }
  0x12   : > { %s267_s2 = scalar_lea.vmem (!%p95_p10), %s422_s26, 1024  ;;  %s346_s3 = smov (!%p95_p10), [#allocation2]  }
  0x13   : > { %p268_p11 = scmp.ne.s32.totalorder (!%p95_p10), %s422_s26, %s267_s2  ;;  %s271_s4 = sshll.u32 (!%p95_p10), %s346_s3, 4  ;;  %s272_s4 = int_to_ptr.vmem [resolvable:$false] %s271_s4 }
  0x14   : > { %v110_v0 = vld [vmem:[%s466_s0] sm:$0xff]  ;;  %v345_v1 = vmov 0   ;;  %s273_s5 = scalar_lea.vmem %s272_s4, 2048  ;;  %p274_p0 = scmp.lt.s32.totalorder %s422_s26, %s272_s4 }
  0x15   : > { %266 = vset.pattern.permute.xlu0 %v345_v1  ;;  %p269_p12 = pnand %p268_p11, %p397_p4  ;;  %p275_p1 = scmp.lt.s32.totalorder %s273_s5, %s267_s2 }
  0x16   : > { %113 = vperm.xlu0 %266, %v110_v0  }
  0x17   : > { %p270_p13 = pneg %p269_p12  ;;  %p276_p2 = por %p275_p1, %p274_p0 }
  0x19   : > { %p277_p3 = pnand %p276_p2, %p270_p13 }
  0x91   : > { %v114_v2 = vpop.permute.xlu0 %113 }
  0x92   : > { %116 = vst [vmem:[%s108_s25] sm:$0xff] %v114_v2  ;;  %117 = vst [vmem:[%s108_s25 + $0x8] sm:$0xff] %v114_v2 }
  0x93   : > { %118 = vst [vmem:[%s108_s25 + $0x10] sm:$0xff] %v114_v2  ;;  %119 = vst [vmem:[%s108_s25 + $0x18] sm:$0xff] %v114_v2 }
  0x94   : > { %120 = vst [vmem:[%s108_s25 + $0x20] sm:$0xff] %v114_v2  ;;  %121 = vst [vmem:[%s108_s25 + $0x28] sm:$0xff] %v114_v2 }
  0x95   : > { %122 = vst [vmem:[%s108_s25 + $0x30] sm:$0xff] %v114_v2  ;;  %123 = vst [vmem:[%s108_s25 + $0x38] sm:$0xff] %v114_v2 }
  0x96   : > { %280 = shalt.err (!%p277_p3)
}
  0x97   : > { %s281_s9 = scalar_lea.hbm %s420_s29, 1024  ;;  %s285_s15 = scalar_lea.hbm %s467_s1, 2048 }
  0x98   : > { %p282_p5 = scmp.ne.s32.totalorder %s420_s29, %s281_s9  ;;  %p286_p9 = scmp.lt.s32.totalorder %s420_s29, %s467_s1 }
  0x99   : > { %p287_p10 = scmp.lt.s32.totalorder %s285_s15, %s281_s9 }
  0x9a   : > { %p283_p6 = pnand %p282_p5, %p397_p4 }
  0x9b   : > { %p288_p11 = por %p287_p10, %p286_p9 }
  0x9c   : > { %p284_p7 = pneg %p283_p6 }
  0x9e   : > { %p289_p12 = pnand %p288_p11, %p284_p7 }
  0xa0   : > { %292 = shalt.err (!%p289_p12)
}
  0xa1   : > { %210 = dma.vmem_to_hbm [thread:$0]  (%p397_p4), %s422_s26, 1024, %s420_s29, %s125_s30  }
  0xa2 PF: > { %p216_p13 = scmp.ge.s32.totalorder %s343_s11, 2  ;;  %s153_s21 = sand.u32 1, %s323_s6  }
  0xa3   : > { %s154_s22 = scalar_lea.sflag [#allocation3], %s153_s21 }
  0xa4   : > { %p213_p0 = pnand %p216_p13, %p404_p8 }
  0xa6   : > { %p214_p1 = pneg %p213_p0 }
  0xa8   : > { %318 = dma.done.wait (%p214_p1), %s154_s22, 1024  }
  0xa9   : > { %320 = vsyncadd (%p214_p1), %s154_s22, 4294966272  ;;  %s14_s11 = sadd.s32 1, %s343_s11   ;;  %s470_s6 = smov %s327_s7 }
  0xaa   : > { %p11_p2 = scmp.ge.s32.totalorder %s14_s11, 4   ;;  %s471_s7 = smov %s331_s8 }
  0xab   : > { %s472_s8 = smov %s410_s19  ;;  %s473_s9 = smov %s339_s10 }
  0xac   : > { %s474_s10 = smov %s476_s14  ;;  %13 = sbr.rel (!%p11_p2) target bundleno = 4 (0x4), region = 56 }
  0xb1   :  { %159 = vsyncpa [#allocation3], 1 }
  0xb2   :  { %161 = vsyncpa [#allocation3 + $0x1], 1 }

</bundles_post_ra>
